<compile_context>
chip_gen: v7x
topology: tpu7x:2x2x1
jax: 0.10.0
libtpu: 0.0.40
codegen_flags: <defaults>
</compile_context>

<pallas_src>
import jax
import jax.numpy as jnp
from jax.experimental import pallas as pl
from jax.experimental.pallas import tpu as pltpu

IN_FEATURES = 10
HIDDEN = 5


def mlp_kernel(w1t_ref, b1_ref, w2_ref, b2_ref, x_ref, o_ref):
    """w1t: (5,10) VMEM; b1,w2: (5,1) VMEM; b2: (1,) SMEM; x: (10,TB); o: (1,TB)."""
    # Layer 1 on the MXU: (5, 10) @ (10, TILE_B) -> (5, TILE_B), fp32 contraction.
    h = jnp.dot(
        w1t_ref[...], x_ref[...],
        preferred_element_type=jnp.float32,
        precision=jax.lax.Precision.HIGHEST,
    )
    h = jnp.maximum(h + b1_ref[...], 0.0)                   # bias + ReLU (VPU)
    # Layer 2 (hidden=5): broadcast multiply + sublane reduce (VPU + XLU).
    y = jnp.sum(h * w2_ref[...], axis=0, keepdims=True) + b2_ref[0]
    o_ref[...] = y.astype(o_ref.dtype)                      # lane-dense (1, TILE_B) store


def _round_up(n, m):
    return ((n + m - 1) // m) * m


def _choose_batch_tile(batch, max_tile):
    """Pick a lane-dense batch tile (multiple of 128 lanes)."""
    lanes = _round_up(batch, 128)
    if lanes <= 128:
        return 128                                  # single tiny tile
    if lanes <= 2 * max_tile:
        # Force >= 2 tiles so the "parallel" batch axis can be sharded across
        # both TensorCores on v7x (neutral on single-TC v5e/v6e).
        return _round_up(pl.cdiv(lanes, 2), 128)
    return max_tile


def simple_model_forward(x, w1, b1, w2, b2, *, max_tile_b=16384):
    """x: (B, 10) f32; w1: (10, 5); b1: (5,); w2: (5, 1); b2: (1,). Returns (B, 1)."""
    B, in_f = x.shape
    assert in_f == IN_FEATURES

    w1t = jnp.asarray(w1, jnp.float32).T                     # (5, 10): MXU LHS
    b1c = jnp.asarray(b1, jnp.float32).reshape(HIDDEN, 1)    # (5, 1)
    w2c = jnp.asarray(w2, jnp.float32).reshape(HIDDEN, 1)    # (5, 1)
    b2s = jnp.asarray(b2, jnp.float32).reshape(1)            # (1,): SMEM scalar
    xt = x.T                                                 # (10, B): batch on lanes

    tb = _choose_batch_tile(B, max_tile_b)
    grid = (pl.cdiv(B, tb),)                                 # partial last tile is clipped

    out = pl.pallas_call(
        mlp_kernel,
        out_shape=jax.ShapeDtypeStruct((1, B), x.dtype),
        grid=grid,
        in_specs=[
            pl.BlockSpec((HIDDEN, IN_FEATURES), lambda i: (0, 0)),   # w1^T (whole array)
            pl.BlockSpec((HIDDEN, 1), lambda i: (0, 0)),             # b1
            pl.BlockSpec((HIDDEN, 1), lambda i: (0, 0)),             # w2
            pl.BlockSpec(memory_space=pltpu.MemorySpace.SMEM),       # b2 scalar slab
            pl.BlockSpec((IN_FEATURES, tb), lambda i: (0, i)),       # x tile, batch on lanes
        ],
        out_specs=pl.BlockSpec((1, tb), lambda i: (0, i)),           # lane-dense output tile
        compiler_params=pltpu.CompilerParams(
            dimension_semantics=("parallel",),
            # Let XLA fuse the x.T producer into this kernel's input DMA instead
            # of materializing an extra HBM round-trip for the transposed x.
            allow_input_fusion=[False, False, False, False, True],
        ),
    )(w1t, b1c, w2c, b2s, xt)

    return out.T                                             # back to (B, 1)


def init_params(key):
    """PyTorch-default-style init (U(-1/sqrt(fan_in), +)); weights stored (in, out)."""
    k1, k2, k3, k4 = jax.random.split(key, 4)
    bound1 = 1.0 / jnp.sqrt(10.0)
    bound2 = 1.0 / jnp.sqrt(5.0)
    w1 = jax.random.uniform(k1, (IN_FEATURES, HIDDEN), jnp.float32, -bound1, bound1)
    b1 = jax.random.uniform(k2, (HIDDEN,), jnp.float32, -bound1, bound1)
    w2 = jax.random.uniform(k3, (HIDDEN, 1), jnp.float32, -bound2, bound2)
    b2 = jax.random.uniform(k4, (1,), jnp.float32, -bound2, bound2)
    return w1, b1, w2, b2


if __name__ == "__main__":
    key = jax.random.PRNGKey(0)
    kx, kp = jax.random.split(key)
    w1, b1, w2, b2 = init_params(kp)

    def reference(x):
        # Pure-JAX reference of the PyTorch forward: relu(x @ W1 + b1) @ W2 + b2.
        h = jnp.maximum(jnp.dot(x, w1, precision=jax.lax.Precision.HIGHEST) + b1, 0.0)
        return jnp.dot(h, w2, precision=jax.lax.Precision.HIGHEST) + b2

    # Small primary example (batch=8, 10 features).
    x_small = jax.random.normal(kx, (8, IN_FEATURES), jnp.float32)
    out_small = jax.block_until_ready(simple_model_forward(x_small, w1, b1, w2, b2))
    assert out_small.shape == (8, 1)
    assert jnp.allclose(out_small, reference(x_small), atol=1e-5, rtol=1e-5)

    # Multi-tile, non-multiple-of-128 batch to exercise the grid + boundary clipping.
    x_big = jax.random.normal(kx, (300, IN_FEATURES), jnp.float32)
    out_big = jax.block_until_ready(simple_model_forward(x_big, w1, b1, w2, b2))
    assert out_big.shape == (300, 1)
    assert jnp.allclose(out_big, reference(x_big), atol=1e-5, rtol=1e-5)

    print("KERNEL_OK")
</pallas_src>

<mosaic_0001>
module attributes {stable_mosaic.version = 11 : i64} {
  func.func @mlp_kernel(%arg0: i32, %arg1: memref<5x10xf32, #tpu.memory_space<vmem>>, %arg2: memref<5x1xf32, #tpu.memory_space<vmem>>, %arg3: memref<5x1xf32, #tpu.memory_space<vmem>>, %arg4: memref<1xf32, #tpu.memory_space<smem>>, %arg5: memref<10x128xf32, #tpu.memory_space<vmem>>, %arg6: memref<1x128xf32, #tpu.memory_space<vmem>>) attributes {dimension_semantics = [#tpu.dimension_semantics<parallel>], iteration_bounds = array<i64: 1>, scalar_prefetch = 0 : i64, scratch_operands = 0 : i64, tpu.core_type = #tpu.core_type<tc>, window_params = [{pipeline_mode = #tpu.pipeline_mode<synchronous>, transform_indices = @transform_0, window_bounds = array<i64: 5, 10>}, {pipeline_mode = #tpu.pipeline_mode<synchronous>, transform_indices = @transform_1, window_bounds = array<i64: 5, 1>}, {pipeline_mode = #tpu.pipeline_mode<synchronous>, transform_indices = @transform_2, window_bounds = array<i64: 5, 1>}, {transform_indices = @transform_3, window_bounds = array<i64: 1>}, {transform_indices = @transform_4, window_bounds = array<i64: 10, 128>}, {transform_indices = @transform_5, window_bounds = array<i64: 1, 128>}]} {
    %c0 = arith.constant 0 : index
    %c0_0 = arith.constant 0 : index
    %0 = vector.load %arg1[%c0, %c0_0] : memref<5x10xf32, #tpu.memory_space<vmem>>, vector<5x10xf32>
    %c0_1 = arith.constant 0 : index
    %c0_2 = arith.constant 0 : index
    %1 = vector.load %arg5[%c0_1, %c0_2] : memref<10x128xf32, #tpu.memory_space<vmem>>, vector<10x128xf32>
    %cst = arith.constant dense<0.000000e+00> : vector<5x128xf32>
    %2 = tpu.matmul %0, %1, %cst {dimension_numbers = #tpu.dot_dimension_numbers<[1], [0], [0], [1], [0, 0, 1, 1], [], []>, precision = #tpu.contract_precision<fp32>} : vector<5x10xf32>, vector<10x128xf32>, vector<5x128xf32> -> vector<5x128xf32>
    %c0_3 = arith.constant 0 : index
    %c0_4 = arith.constant 0 : index
    %3 = vector.load %arg2[%c0_3, %c0_4] : memref<5x1xf32, #tpu.memory_space<vmem>>, vector<5x1xf32>
    %4 = vector.broadcast %3 : vector<5x1xf32> to vector<5x128xf32>
    %5 = arith.addf %2, %4 : vector<5x128xf32>
    %cst_5 = arith.constant 0.000000e+00 : f32
    %6 = vector.broadcast %cst_5 : f32 to vector<5x128xf32>
    %7 = arith.maximumf %5, %6 : vector<5x128xf32>
    %c0_6 = arith.constant 0 : index
    %c0_7 = arith.constant 0 : index
    %8 = vector.load %arg3[%c0_6, %c0_7] : memref<5x1xf32, #tpu.memory_space<vmem>>, vector<5x1xf32>
    %9 = vector.broadcast %8 : vector<5x1xf32> to vector<5x128xf32>
    %10 = arith.mulf %7, %9 : vector<5x128xf32>
    %cst_8 = arith.constant dense<0.000000e+00> : vector<128xf32>
    %11 = vector.multi_reduction <add>, %10, %cst_8 [0] : vector<5x128xf32> to vector<128xf32>
    %12 = vector.shape_cast %11 : vector<128xf32> to vector<1x128xf32>
    %c0_9 = arith.constant 0 : index
    %13 = memref.load %arg4[%c0_9] : memref<1xf32, #tpu.memory_space<smem>>
    %14 = vector.broadcast %13 : f32 to vector<1x128xf32>
    %15 = arith.addf %12, %14 : vector<1x128xf32>
    %c0_10 = arith.constant 0 : index
    %c0_11 = arith.constant 0 : index
    %16 = vector.load %arg6[%c0_10, %c0_11] : memref<1x128xf32, #tpu.memory_space<vmem>>, vector<1x128xf32>
    tpu.vector_store %arg6[%c0_10, %c0_11], %15 {strides = array<i32>} : memref<1x128xf32, #tpu.memory_space<vmem>>, vector<1x128xf32>,
    return
  }
  func.func @transform_0(%arg0: i32) -> (i32, i32) {
    %c0_i32 = arith.constant 0 : i32
    %c0_i32_0 = arith.constant 0 : i32
    %c0_i32_1 = arith.constant 0 : i32
    return %c0_i32, %c0_i32_0 : i32, i32
  }
  func.func @transform_1(%arg0: i32) -> (i32, i32) {
    %c0_i32 = arith.constant 0 : i32
    %c0_i32_0 = arith.constant 0 : i32
    %c0_i32_1 = arith.constant 0 : i32
    return %c0_i32, %c0_i32_0 : i32, i32
  }
  func.func @transform_2(%arg0: i32) -> (i32, i32) {
    %c0_i32 = arith.constant 0 : i32
    %c0_i32_0 = arith.constant 0 : i32
    %c0_i32_1 = arith.constant 0 : i32
    return %c0_i32, %c0_i32_0 : i32, i32
  }
  func.func @transform_3(%arg0: i32) -> i32 {
    %c0_i32 = arith.constant 0 : i32
    %c0_i32_0 = arith.constant 0 : i32
    return %c0_i32 : i32
  }
  func.func @transform_4(%arg0: i32) -> (i32, i32) {
    %c0_i32 = arith.constant 0 : i32
    %c0_i32_0 = arith.constant 0 : i32
    return %c0_i32, %arg0 : i32, i32
  }
  func.func @transform_5(%arg0: i32) -> (i32, i32) {
    %c0_i32 = arith.constant 0 : i32
    %c0_i32_0 = arith.constant 0 : i32
    return %c0_i32, %arg0 : i32, i32
  }
}

</mosaic_0001>

<bundles_post_ra>
// kernel: tpu_custom_call.1
= control target key start
LH: loop header
LB: loop body
LE: loop exit
PB: predicated region body
PF: predicated region fallthrough
CT: control target
= control target key end

     0   :  { %vm35_vm0 = vcmask 1041408   ;;  %v650_v2 = vmov 0.0|0.0   ;;  %vm31_vm1 = vcmask 80896   ;;  %vm651_vm2 = vmmov 0   ;;  %s721_s0 = inlined_call_operand.vmem [shape: f32[5,10], index: 0, kind: input, shape index: {}]   ;;  %s722_s1 = inlined_call_operand.vmem [shape: f32[5,1], index: 1, kind: input, shape index: {}]   ;;  %s723_s2 = inlined_call_operand.vmem [shape: f32[5,1], index: 2, kind: input, shape index: {}]   ;;  %s724_s3 = inlined_call_operand.<no memory space> [shape: f32[1], index: 3, kind: input, shape index: {}]   ;;  %s725_s4 = inlined_call_operand.vmem [shape: f32[10,8], index: 4, kind: input, shape index: {}]   ;;  %s726_s5 = inlined_call_operand.hbm [shape: f32[1,8], index: 5, kind: output, shape index: {}]  }
   0x1   :  { %v23_v0 = vld [vmem:[%s725_s4] sm:$0xff]  ;;  %v24_v1 = vld [vmem:[%s725_s4 + $0x8] sm:$0x3]  ;;  %601 = vmatprep.subr.bf16.mxu0 %v650_v2  ;;  %592 = vmatprep.subr.bf16.mxu1 %v650_v2  ;;  %v652_v7 = vmov 0.0   ;;  %v653_v12 = vmov 0  }
   0x2   :  { %v37_v3 = vsel %vm35_vm0, %v24_v1, 0  ;;  %v40_v4 = vand.u32 4294901760, %v23_v0  ;;  %v22_v5 = vld [vmem:[%s721_s0] sm:$0x1f]  ;;  %575 = vmatprep.mubr.msk.f32.mxu0 %vm651_vm2, %v652_v7  ;;  %554 = vmatprep.mubr.msk.f32.mxu1 %vm651_vm2, %v652_v7 }
   0x3   :  { %v43_v6 = vand.u32 4294901760, %v37_v3  ;;  %v33_v8 = vsel %vm31_vm1, %v22_v5, 0  ;;  %v25_v9 = vld [vmem:[%s722_s1] sm:$0x1f]  ;;  %625 = vset.pattern.permute.xlu0 %v653_v12 }
   0x4   :  { %v118_v10 = vsub.f32 %v23_v0, %v40_v4  ;;  %v106_v11 = vand.u32 4294901760, %v33_v8 }
   0x5   :  { %11 = vsyncpa [#allocation4], 0  ;;  %v593_v13 = vpack.c.bf16 %v43_v6, %v40_v4  ;;  %v125_v14 = vsub.f32 %v37_v3, %v43_v6  ;;  %28 = vperm.xlu0 %625, %v25_v9   ;;  %v499_v17 = vld [vmem:[%s723_s2] sm:$0x1f]  ;;  %vm506_vm3 = vcmask 1044480   ;;  %v515_v45 = vstv %s724_s3  ;;  %s654_s26 = smov [#allocation3]  }
   0x6   :  { %v107_v15 = vsub.f32 %v33_v8, %v106_v11  ;;  %v119_v16 = vand.u32 4294901760, %v118_v10  ;;  %s524_s27 = sshll.u32 %s654_s26, 4  ;;  %s525_s27 = int_to_ptr.vmem [resolvable:$true] %s524_s27 }
   0x7   :  { %603 = vmatpush3.bf16.msra.mxu0 %v593_v13  ;;  %594 = vmatpush3.bf16.msra.mxu1 %v593_v13  ;;  %v126_v18 = vand.u32 4294901760, %v125_v14  ;;  %v599_v28 = vpack.c.bf16 %v125_v14, %v118_v10  ;;  %s626_s28 = scalar_lea.vmem %s525_s27, 16  ;;  %s630_s29 = scalar_lea.vmem %s525_s27, 32 }
   0x8   :  { %v108_v19 = vand.u32 4294901760, %v107_v15  ;;  %595 = vmatprep.subr.bf16.mxu1 %v650_v2  ;;  %604 = vmatprep.subr.bf16.mxu0 %v650_v2  ;;  %v120_v20 = vsub.f32 %v118_v10, %v119_v16  ;;  %p627_p0 = scmp.ne.s32.totalorder %s525_s27, %s626_s28  ;;  %p631_p1 = scmp.lt.s32.totalorder %s525_s27, %s525_s27 }
   0x9   :  { %v127_v21 = vsub.f32 %v125_v14, %v126_v18  ;;  %v605_v22 = vpack.c.bf16 %v126_v18, %v119_v16  ;;  %502 = vperm.xlu0 %625, %v499_v17   ;;  %p632_p2 = scmp.lt.s32.totalorder %s630_s29, %s626_s28 }
   0xa   :  { %576 = vmatmul.mubr.f32.vlgmr.msra.gmra.mrb[0].mxu0 %v108_v19  ;;  %v109_v23 = vsub.f32 %v107_v15, %v108_v19  ;;  %v121_v24 = vand.u32 4294901760, %v120_v20 }
   0xb   :  { %v128_v25 = vand.u32 4294901760, %v127_v21  ;;  %606 = vmatpush3.bf16.msra.mxu0 %v605_v22  ;;  %582 = vmatprep.mubr.msk.f32.mxu0 %vm651_vm2, %v652_v7  ;;  %p633_p3 = por %p632_p2, %p631_p1 }
   0xc   :  { %v110_v26 = vand.u32 4294901760, %v109_v23  ;;  %607 = vmatprep.subr.bf16.mxu0 %v650_v2 }
   0xd   :  { %v596_v27 = vpack.c.bf16 %v128_v25, %v121_v24  ;;  %p634_p4 = pnand %p633_p3, %p627_p0 }
   0xe   :  { %555 = vmatmul.mubr.f32.vlgmr.msra.gmra.mrb[0].mxu1 %v110_v26 }
   0xf   :  { %597 = vmatpush3.bf16.msra.mxu1 %v596_v27  ;;  %561 = vmatprep.mubr.msk.f32.mxu1 %vm651_vm2, %v652_v7 }
  0x10   :  { %598 = vmatprep.subr.bf16.mxu1 %v650_v2 }
  0x12   :  { %583 = vmatmul.mubr.f32.vlgmr.msra.gmra.mrb[0].mxu0 %v106_v11 }
  0x13   :  { %609 = vmatpush3.bf16.msra.mxu0 %v593_v13  ;;  %589 = vmatprep.mubr.msk.f32.mxu0 %vm651_vm2, %v652_v7 }
  0x16   :  { %562 = vmatmul.mubr.f32.vlgmr.msra.gmra.mrb[0].mxu1 %v106_v11 }
  0x17   :  { %600 = vmatpush3.bf16.msra.mxu1 %v599_v28  ;;  %568 = vmatprep.mubr.msk.f32.mxu1 %vm651_vm2, %v652_v7 }
  0x1a   :  { %590 = vmatmul.mubr.f32.vlgmr.msra.gmra.mrb[0].mxu0 %v106_v11 }
  0x1e   :  { %569 = vmatmul.mubr.f32.vlgmr.msra.gmra.mrb[0].mxu1 %v107_v15 }
  0x84   :  { %v29_v31 = vpop.permute.xlu0 %28 }
  0x88   :  { %v503_v37 = vpop.permute.xlu0 %502 }
  0xed   :  { %v494_v29 = vpop.f32.mrb[0].mxu0 }
  0xee   :  { %v591_v30 = vpop.f32.mrb[1].mxu0 }
  0xf1   :  { %v269_v32 = vpop.f32.mrb[0].mxu1 }
  0xf2   :  { %v610_v33 = vadd.f32 %v269_v32, %v29_v31  ;;  %v570_v34 = vpop.f32.mrb[1].mxu1 }
  0xf4   :  { %v611_v35 = vadd.f32 %v610_v33, %v494_v29 }
  0xf6   :  { %v498_v36 = vmax.f32 %v611_v35, 0.0 }
  0xf8   :  { %v505_v38 = vmul.f32 %v503_v37, %v498_v36 }
  0xfa   :  { %v507_v39 = vsel %vm506_vm3, %v505_v38, 0.0 }
  0xfb   :  { %v508_v40 = vrot.slane %v507_v39, 4 }
  0xfd   :  { %v509_v41 = vadd.f32 %v508_v40, %v507_v39 }
  0xff   :  { %v510_v42 = vrot.slane %v509_v41, 2 }
 0x101   :  { %v511_v43 = vadd.f32 %v510_v42, %v509_v41 }
 0x103   :  { %v512_v44 = vrot.slane %v511_v43, 1 }
 0x105   :  { %v513_v46 = vadd.f32 %v512_v44, %v511_v43 }
 0x107   :  { %v516_v47 = vadd.f32 %v515_v45, %v513_v46 }
 0x109   :  { %517 = vst [vmem:[#allocation3] sm:$0x1] %v516_v47 }
 0x10a   :  { %637 = shalt.err (!%p634_p4)
}
 0x10b   :  { %s638_s7 = scalar_lea.hbm %s726_s5, 16 }
 0x10c   :  { %p639_p5 = scmp.ne.s32.totalorder %s726_s5, %s638_s7  ;;  %p642_p6 = scmp.lt.u32.totalorder %s638_s7, %s726_s5 }
 0x10e   :  { %p644_p7 = pnand %p642_p6, %p639_p5 }
 0x110   :  { %647 = shalt.err (!%p644_p7)
}
 0x111   :  { %527 = dma.vmem_to_hbm [thread:$0]  %s525_s27, 16, %s726_s5, [#allocation4]  }
 0x112   :  { %648 = dma.done.wait [#allocation4], 16  }
 0x113   :  { %649 = vsyncadd [#allocation4], 4294967280 }
 0x114   :  { %531 = vsyncpa [#allocation4], 1 }

</bundles_post_ra>
